<compile_context>
chip_gen: v5e
topology: v5e:2x2
jax: 0.10.0
libtpu: 0.0.40
codegen_flags: <defaults>
</compile_context>

<pallas_src>
import jax
import jax.numpy as jnp
from jax.experimental import pallas as pl
from jax.experimental.pallas import tpu as pltpu

_MIB = 1024 * 1024


def _pos_embed_kernel(x_ref, row0_ref, rest_ref, o_ref):
    # x_ref:    (TB, S, D)  patch embeddings for TB batch rows
    # row0_ref: (1, 1, D)   cls_token + pos_embedding[0]   (resident, pre-folded)
    # rest_ref: (1, S, D)   pos_embedding[1:]              (resident)
    # o_ref:    (TB, P, D)  P = S + 1
    tb, _, d = o_ref.shape
    row0 = jnp.broadcast_to(row0_ref[...], (tb, 1, d))
    body = x_ref[...] + rest_ref[...]                       # broadcast over batch rows
    # Single full-block store (dense vst except the P % 8 sublane tail) instead
    # of a sublane-offset body store + strided per-row cls store.
    o_ref[...] = jnp.concatenate([row0, body], axis=1)


def _round_up(x, m):
    return -(-x // m) * m


def _tpu_vmem_capacity_bytes():
    """Per-core VMEM capacity; falls back to 128 MiB if the query is unavailable."""
    try:
        info = pltpu.get_tpu_info()
        cap = int(getattr(info, "vmem_capacity_bytes", 128 * _MIB))
        return cap if cap > 0 else 128 * _MIB
    except Exception:
        return 128 * _MIB


def _choose_block_batch(B, S, P, D, itemsize, budget_bytes):
    """Largest per-step batch tile whose double-buffered, sublane-padded blocks fit."""
    s_pad = _round_up(S, 8)
    p_pad = _round_up(P, 8)
    # x block + out block, each double-buffered by the Pallas pipeline.
    per_row = 2 * (s_pad * D + p_pad * D) * itemsize
    # Resident pos slabs (row0 padded to 8 sublanes + rest); count the hidden
    # second buffer Pallas allocates even for constant-index blocks.
    resident = 2 * (8 * D + s_pad * D) * itemsize
    tb = (budget_bytes - resident) // per_row
    return int(max(1, min(tb, B)))


def positional_embedding(x, cls_token, pos_embedding, *, block_batch=None):
    """x: (B, S, D); cls_token: (1, 1, D); pos_embedding: (1, P, D), P = S + 1."""
    B, S, D = x.shape
    P = pos_embedding.shape[1]
    assert P == S + 1, "position embedding length must equal seq_len + 1"

    dtype = x.dtype
    itemsize = jnp.dtype(dtype).itemsize

    # Fold cls token into row 0 of the positional embedding (tiny one-time XLA
    # add) and split into resident slabs, pinned to the activation dtype.
    pos_row0 = (pos_embedding[:, :1, :] + cls_token).astype(dtype)   # (1, 1, D)
    pos_rest = pos_embedding[:, 1:, :].astype(dtype)                 # (1, S, D)

    # Generation-aware VMEM budget, also used as the Mosaic scoped-VMEM limit.
    vmem_cap = _tpu_vmem_capacity_bytes()
    vmem_budget = int(max(8 * _MIB, min(96 * _MIB, (vmem_cap * 5) // 8)))

    if block_batch is None:
        tb = _choose_block_batch(B, S, P, D, itemsize, vmem_budget)
        # Only split for parallelism on 2-TensorCore chips (v7x: 64 MiB VMEM),
        # and never below a ~512-sublane-per-block floor.
        two_cores = vmem_cap <= 64 * _MIB
        if two_cores and B >= 2 and (tb // 2) * S >= 512:
            tb = min(tb, max(1, B // 2))
    else:
        tb = int(block_batch)
    tb = max(1, min(tb, B))

    grid = (pl.cdiv(B, tb),)  # ragged last block: OOB output writes are masked

    cost = pl.CostEstimate(
        flops=B * P * D,
        transcendentals=0,
        bytes_accessed=(B * S * D + P * D + B * P * D) * itemsize,
    )

    return pl.pallas_call(
        _pos_embed_kernel,
        out_shape=jax.ShapeDtypeStruct((B, P, D), dtype),
        grid=grid,
        in_specs=[
            pl.BlockSpec((tb, S, D), lambda b: (b, 0, 0)),   # x: TB batch rows per step
            pl.BlockSpec((1, 1, D), lambda b: (0, 0, 0)),    # cls + pos[0], resident
            pl.BlockSpec((1, S, D), lambda b: (0, 0, 0)),    # pos[1:],      resident
        ],
        out_specs=pl.BlockSpec((tb, P, D), lambda b: (b, 0, 0)),
        compiler_params=pltpu.CompilerParams(
            dimension_semantics=("parallel",),
            vmem_limit_bytes=vmem_budget,
        ),
        cost_estimate=cost,
    )(x, pos_row0, pos_rest)


def reference(x, cls_token, pos_embedding):
    B = x.shape[0]
    cls = jnp.broadcast_to(cls_token, (B, 1, x.shape[2]))
    return jnp.concatenate([cls, x], axis=1) + pos_embedding


if __name__ == "__main__":
    # Small shapes consistent with the module: batch=2, seq=8 patches,
    # d_model=128 (lane-dense last dim)  ->  n_patches (including cls) = 9.
    B, S, D = 2, 8, 128
    P = S + 1

    key = jax.random.PRNGKey(0)
    k_x, k_cls, k_pos = jax.random.split(key, 3)

    x = jax.random.normal(k_x, (B, S, D), dtype=jnp.float32)
    cls_token = jax.random.normal(k_cls, (1, 1, D), dtype=jnp.float32)      # torch.randn((1,1,d_model))
    pos_embedding = jax.random.normal(k_pos, (1, P, D), dtype=jnp.float32)  # torch.randn((1,n_patches,d_model))

    out = positional_embedding(x, cls_token, pos_embedding)
    out = jax.block_until_ready(out)

    ref = reference(x, cls_token, pos_embedding)
    assert out.shape == (B, P, D)
    assert jnp.allclose(out, ref, atol=1e-6, rtol=1e-6), "mismatch vs reference"

    print("KERNEL_OK")
</pallas_src>

<mosaic_0001>
module attributes {stable_mosaic.version = 11 : i64} {
  func.func @_pos_embed_kernel(%arg0: i32, %arg1: memref<2x8x128xf32, #tpu.memory_space<vmem>>, %arg2: memref<1x1x128xf32, #tpu.memory_space<vmem>>, %arg3: memref<1x8x128xf32, #tpu.memory_space<vmem>>, %arg4: memref<2x9x128xf32, #tpu.memory_space<vmem>>) attributes {dimension_semantics = [#tpu.dimension_semantics<parallel>], iteration_bounds = array<i64: 1>, scalar_prefetch = 0 : i64, scratch_operands = 0 : i64, tpu.core_type = #tpu.core_type<tc>, window_params = [{transform_indices = @transform_0, window_bounds = array<i64: 2, 8, 128>}, {pipeline_mode = #tpu.pipeline_mode<synchronous>, transform_indices = @transform_1, window_bounds = array<i64: 1, 1, 128>}, {pipeline_mode = #tpu.pipeline_mode<synchronous>, transform_indices = @transform_2, window_bounds = array<i64: 1, 8, 128>}, {transform_indices = @transform_3, window_bounds = array<i64: 2, 9, 128>}]} {
    %c0 = arith.constant 0 : index
    %c0_0 = arith.constant 0 : index
    %c0_1 = arith.constant 0 : index
    %0 = vector.load %arg2[%c0, %c0_0, %c0_1] : memref<1x1x128xf32, #tpu.memory_space<vmem>>, vector<1x1x128xf32>
    %1 = vector.shape_cast %0 : vector<1x1x128xf32> to vector<1x1x128xf32>
    %2 = vector.broadcast %1 : vector<1x1x128xf32> to vector<2x1x128xf32>
    %c0_2 = arith.constant 0 : index
    %c0_3 = arith.constant 0 : index
    %c0_4 = arith.constant 0 : index
    %3 = vector.load %arg1[%c0_2, %c0_3, %c0_4] : memref<2x8x128xf32, #tpu.memory_space<vmem>>, vector<2x8x128xf32>
    %c0_5 = arith.constant 0 : index
    %c0_6 = arith.constant 0 : index
    %c0_7 = arith.constant 0 : index
    %4 = vector.load %arg3[%c0_5, %c0_6, %c0_7] : memref<1x8x128xf32, #tpu.memory_space<vmem>>, vector<1x8x128xf32>
    %5 = vector.broadcast %4 : vector<1x8x128xf32> to vector<2x8x128xf32>
    %6 = arith.addf %3, %5 : vector<2x8x128xf32>
    %7 = tpu.concatenate %2, %6 in 1 : vector<2x1x128xf32>, vector<2x8x128xf32> -> vector<2x9x128xf32>
    %c0_8 = arith.constant 0 : index
    %c0_9 = arith.constant 0 : index
    %c0_10 = arith.constant 0 : index
    %8 = vector.load %arg4[%c0_8, %c0_9, %c0_10] : memref<2x9x128xf32, #tpu.memory_space<vmem>>, vector<2x9x128xf32>
    tpu.vector_store %arg4[%c0_8, %c0_9, %c0_10], %7 {strides = array<i32>} : memref<2x9x128xf32, #tpu.memory_space<vmem>>, vector<2x9x128xf32>,
    return
  }
  func.func @transform_0(%arg0: i32) -> (i32, i32, i32) {
    %c0_i32 = arith.constant 0 : i32
    %c0_i32_0 = arith.constant 0 : i32
    %c0_i32_1 = arith.constant 0 : i32
    return %arg0, %c0_i32, %c0_i32_0 : i32, i32, i32
  }
  func.func @transform_1(%arg0: i32) -> (i32, i32, i32) {
    %c0_i32 = arith.constant 0 : i32
    %c0_i32_0 = arith.constant 0 : i32
    %c0_i32_1 = arith.constant 0 : i32
    %c0_i32_2 = arith.constant 0 : i32
    return %c0_i32, %c0_i32_0, %c0_i32_1 : i32, i32, i32
  }
  func.func @transform_2(%arg0: i32) -> (i32, i32, i32) {
    %c0_i32 = arith.constant 0 : i32
    %c0_i32_0 = arith.constant 0 : i32
    %c0_i32_1 = arith.constant 0 : i32
    %c0_i32_2 = arith.constant 0 : i32
    return %c0_i32, %c0_i32_0, %c0_i32_1 : i32, i32, i32
  }
  func.func @transform_3(%arg0: i32) -> (i32, i32, i32) {
    %c0_i32 = arith.constant 0 : i32
    %c0_i32_0 = arith.constant 0 : i32
    %c0_i32_1 = arith.constant 0 : i32
    return %arg0, %c0_i32, %c0_i32_0 : i32, i32, i32
  }
}

</mosaic_0001>

<bundles_post_ra>
// kernel: tpu_custom_call.1
= control target key start
LH: loop header
LB: loop body
LE: loop exit
PB: predicated region body
PF: predicated region fallthrough
CT: control target
= control target key end

     0   :  { %8 = vsyncpa [#allocation3], 0  ;;  %s209_s0 = inlined_call_operand.hbm [shape: f32[2,8,128], index: 0, kind: input, shape index: {}]   ;;  %s210_s1 = inlined_call_operand.hbm [shape: f32[1,1,128], index: 1, kind: input, shape index: {}]   ;;  %s211_s2 = inlined_call_operand.hbm [shape: f32[1,8,128], index: 2, kind: input, shape index: {}]   ;;  %s212_s3 = inlined_call_operand.vmem [shape: f32[2,9,128], index: 3, kind: output, shape index: {}]  }
   0x1   :  { %9 = vsyncpa [#allocation5], 0  ;;  %s28_s14 = sshll.u32 %s210_s1, 4  ;;  %s163_s15 = smov [#allocation4]   ;;  %s29_s14 = int_to_ptr.hbm [resolvable:$true] %s28_s14 }
   0x2   :  { %s30_s16 = sshll.u32 %s163_s15, 4  ;;  %s14_s19 = sshll.u32 %s209_s0, 4  ;;  %s31_s16 = int_to_ptr.vmem [resolvable:$true] %s30_s16  ;;  %s15_s19 = int_to_ptr.hbm [resolvable:$true] %s14_s19 }
   0x3   :  { %33 = dma.hbm_to_vmem [thread:$0]  %s29_s14, 16, %s31_s16, [#allocation5]  }
   0x4   :  { %s164_s20 = smov [#allocation2]   ;;  %s165_s22 = smov 128  }
   0x5   :  { %s16_s21 = sshll.u32 %s164_s20, 4  ;;  %s166_s23 = smov 8   ;;  %s17_s21 = int_to_ptr.vmem [resolvable:$true] %s16_s21 }
   0x6   :  { %22 = dma.hbm_to_vmem [thread:$0]  %s15_s19, 256, %s17_s21, [#allocation3], %s165_s22, %s165_s22, %s166_s23  }
   0x7   :  { %s39_s1 = sshll.u32 %s211_s2, 4  ;;  %s167_s26 = smov [#allocation6]   ;;  %s40_s1 = int_to_ptr.hbm [resolvable:$true] %s39_s1 }
   0x8   :  { %s41_s27 = sshll.u32 %s167_s26, 4  ;;  %s42_s27 = int_to_ptr.vmem [resolvable:$true] %s41_s27 }
   0x9   :  { %44 = dma.hbm_to_vmem [thread:$0]  %s40_s1, 128, %s42_s27, [#allocation5]  }
   0xa   :  { %159 = dma.done.wait [#allocation3], 256  }
   0xb   :  { %160 = vsyncadd [#allocation3], 4294967040 }
   0xc   :  { %161 = dma.done.wait [#allocation5], 144  }
   0xd   :  { %162 = vsyncadd [#allocation5], 4294967152  ;;  %v58_v0 = vld [vmem:[#allocation2] sm:$0xff]  ;;  %v60_v1 = vld [vmem:[#allocation6] sm:$0xff]  ;;  %vm69_vm0 = vcmask 1040384  }
   0xe   :  { %v61_v2 = vadd.f32 %v60_v1, %v58_v0  ;;  %v59_v3 = vld [vmem:[#allocation2 + $0x8] sm:$0xff]  ;;  %v57_v4 = vld [vmem:[#allocation4] sm:$0x1] }
   0xf   :  { %v62_v5 = vadd.f32 %v60_v1, %v59_v3 }
  0x10   :  { %v65_v6 = vrot.slane %v61_v2, 7 }
  0x11   :  { %v66_v7 = vrot.slane %v62_v5, 7 }
  0x12   :  { %v70_v8 = vsel %vm69_vm0, %v57_v4, %v65_v6  ;;  %73 = vst [vmem:[%s212_s3 + $0x8] sm:$0x1] %v65_v6 }
  0x13   :  { %72 = vst [vmem:[%s212_s3] sm:$0xff] %v70_v8  ;;  %v71_v9 = vsel %vm69_vm0, %v57_v4, %v66_v7 }
  0x14   :  { %74 = vst [vmem:[%s212_s3 + $0x10] sm:$0xff] %v71_v9 }
  0x15   :  { %75 = vst [vmem:[%s212_s3 + $0x18] sm:$0x1] %v66_v7 }
  0x16   :  { %80 = vsyncpa [#allocation3], 1 }
  0x17   :  { %81 = vsyncpa [#allocation5], 1 }

</bundles_post_ra>
